<compile_context>
chip_gen: v6e
topology: v6e:2x2x1
jax: 0.10.0
libtpu: 0.0.40
codegen_flags: <defaults>
</compile_context>

<pallas_src>
import jax
import jax.numpy as jnp
from jax.experimental import pallas as pl
from jax.experimental.pallas import tpu as pltpu

NEG_SLOPE = 0.01   # F.leaky_relu default negative_slope
LANE = 128
OUT_DIM = 20


def _round_up(n, m):
    return ((n + m - 1) // m) * m


def _leaky_relu(h):
    return jnp.where(h > 0, h, NEG_SLOPE * h)


def post_encoder_kernel(x_ref, w1_ref, b1_ref, w2_ref, b2_ref, w3_ref, b3_ref,
                        o_ref):
    # fc1: MXU matmul in x's dtype, f32 accumulation; f32 epilogue on the VPU.
    h = jnp.dot(x_ref[...], w1_ref[...], preferred_element_type=jnp.float32)
    h = _leaky_relu(h + b1_ref[...])
    # fc2 / fc3 stay fully f32 (weights are VMEM-resident; no HBM to save).
    h = jnp.dot(h, w2_ref[...], preferred_element_type=jnp.float32)
    h = _leaky_relu(h + b2_ref[...])
    h = jnp.dot(h, w3_ref[...], preferred_element_type=jnp.float32)
    h = _leaky_relu(h + b3_ref[...])
    o_ref[...] = h.astype(o_ref.dtype)


def prepare_params(params, x_dtype=jnp.float32):
    """Pad/cast parameters ONCE (not per forward call).

    Weights are [in, out]. The hidden dim is zero-padded to a multiple of 128
    so intermediates are lane-dense; padded weight/bias entries are exactly
    zero, so the real columns are numerically unchanged (leaky_relu(0) == 0).
    The fc3 output dim is left at its true width (20) — no output padding.
    """
    w1, b1, w2, b2, w3, b3 = params
    _, hidden = w1.shape
    hid_p = _round_up(hidden, LANE)
    dh = hid_p - hidden
    w1p = jnp.pad(w1, ((0, 0), (0, dh))).astype(x_dtype)       # [in1, hid_p]
    b1p = jnp.pad(b1, ((0, 0), (0, dh))).astype(jnp.float32)   # [1,  hid_p]
    w2p = jnp.pad(w2, ((0, dh), (0, dh))).astype(jnp.float32)  # [hid_p, hid_p]
    b2p = jnp.pad(b2, ((0, 0), (0, dh))).astype(jnp.float32)   # [1,  hid_p]
    w3p = jnp.pad(w3, ((0, dh), (0, 0))).astype(jnp.float32)   # [hid_p, 20]
    b3p = b3.astype(jnp.float32)                               # [1,  20]
    return (w1p, b1p, w2p, b2p, w3p, b3p)


def _choose_tile(B, bytes_per_row, tb_max, vmem_buf_budget):
    """Batch tile: multiple of 8, large enough to amortize grid-step overhead,
    small enough that double-buffered x+out fits the VMEM budget, and (when B
    allows) leaving >= 2 grid steps so v7x's two TensorCores both get work."""
    B8 = _round_up(max(int(B), 1), 8)
    if B8 <= 8:
        tb = 8
    else:
        half = _round_up(pl.cdiv(B8, 2), 8)
        tb = min(tb_max, half)
    cap = max(8, (vmem_buf_budget // (2 * bytes_per_row)) // 8 * 8)
    return max(8, min(tb, cap))


def post_encoder_forward(x, prepared_params, *, tb_max=4096,
                         vmem_buf_budget=16 << 20):
    """x: [B, 4, latent_size] (f32 or bf16) -> [B, 20] float32."""
    w1p, b1p, w2p, b2p, w3p, b3p = prepared_params
    in1 = w1p.shape[0]
    out_dim = w3p.shape[1]
    B = x.shape[0]

    h0 = x.reshape(B, -1)          # contiguous trailing-dim flatten (free view)
    assert h0.shape[1] == in1, (h0.shape, in1)

    bytes_per_row = in1 * h0.dtype.itemsize + out_dim * 4
    TB = _choose_tile(B, bytes_per_row, tb_max, vmem_buf_budget)
    B_pad = _round_up(B, TB)
    if B_pad != B:                 # materialize a padded copy only when needed
        h0 = jnp.pad(h0, ((0, B_pad - B), (0, 0)))

    weight_bytes = sum(int(p.size) * p.dtype.itemsize for p in prepared_params)
    need = 2 * TB * bytes_per_row + 2 * weight_bytes + (8 << 20)
    vmem_limit = int(min(max(need, 32 << 20), 64 << 20))

    resident = lambda shape: pl.BlockSpec(shape, lambda i: (0, 0))

    out = pl.pallas_call(
        post_encoder_kernel,
        out_shape=jax.ShapeDtypeStruct((B_pad, out_dim), jnp.float32),
        grid=(B_pad // TB,),
        in_specs=[
            pl.BlockSpec((TB, in1), lambda i: (i, 0)),   # x tile, pipelined
            resident(w1p.shape), resident(b1p.shape),    # weights VMEM-resident
            resident(w2p.shape), resident(b2p.shape),
            resident(w3p.shape), resident(b3p.shape),
        ],
        out_specs=pl.BlockSpec((TB, out_dim), lambda i: (i, 0)),
        compiler_params=pltpu.CompilerParams(
            dimension_semantics=("parallel",),           # megacore on v7x
            vmem_limit_bytes=vmem_limit),
    )(h0, w1p, b1p, w2p, b2p, w3p, b3p)

    return out[:B] if B_pad != B else out


def init_params(key, latent_size):
    """Deterministic synthetic parameters (shapes from Post_Encoder.__init__)."""
    hidden = latent_size
    in1 = latent_size * 4
    ks = jax.random.split(key, 6)
    # weights stored as [in, out] (transposed vs. torch Linear's [out, in])
    w1 = jax.random.normal(ks[0], (in1, hidden), jnp.float32) * 0.05
    b1 = jax.random.normal(ks[1], (1, hidden), jnp.float32) * 0.05
    w2 = jax.random.normal(ks[2], (hidden, hidden), jnp.float32) * 0.05
    b2 = jax.random.normal(ks[3], (1, hidden), jnp.float32) * 0.05
    w3 = jax.random.normal(ks[4], (hidden, OUT_DIM), jnp.float32) * 0.05
    b3 = jax.random.normal(ks[5], (1, OUT_DIM), jnp.float32) * 0.05
    return (w1, b1, w2, b2, w3, b3)


def reference_forward(x, params):
    """Pure-JAX reference of the PyTorch forward (for sanity check)."""
    w1, b1, w2, b2, w3, b3 = params
    h = x.reshape(x.shape[0], -1).astype(jnp.float32)
    h = jax.nn.leaky_relu(h @ w1 + b1, NEG_SLOPE)
    h = jax.nn.leaky_relu(h @ w2 + b2, NEG_SLOPE)
    h = jax.nn.leaky_relu(h @ w3 + b3, NEG_SLOPE)
    return h


if __name__ == "__main__":
    key = jax.random.PRNGKey(0)
    k_x, k_x2, k_p = jax.random.split(key, 3)

    latent_size = 32  # config.latent_size
    params = init_params(k_p, latent_size)

    # ---- small batch, f32 path (exact vs reference) ----
    B = 2
    x = jax.random.normal(k_x, (B, 4, latent_size), jnp.float32)
    prepared_f32 = prepare_params(params, x_dtype=jnp.float32)
    out = jax.block_until_ready(post_encoder_forward(x, prepared_f32))
    ref = reference_forward(x, params)
    assert out.shape == (B, OUT_DIM), out.shape
    assert jnp.allclose(out, ref, atol=1e-5, rtol=1e-5), "f32 mismatch vs reference"

    # ---- larger, non-divisible batch: multi-step grid + batch-pad path ----
    B2 = 300
    x2 = jax.random.normal(k_x2, (B2, 4, latent_size), jnp.float32)
    out2 = jax.block_until_ready(post_encoder_forward(x2, prepared_f32))
    ref2 = reference_forward(x2, params)
    assert out2.shape == (B2, OUT_DIM), out2.shape
    assert jnp.allclose(out2, ref2, atol=1e-5, rtol=1e-5), "f32 (B=300) mismatch"

    # ---- bf16-activation path: x already arrives bf16 from the caller; only
    #      the fc1 matmul runs in bf16 (f32 accumulation), rest stays f32. ----
    x_bf16 = x.astype(jnp.bfloat16)
    prepared_bf16 = prepare_params(params, x_dtype=jnp.bfloat16)
    out_bf16 = jax.block_until_ready(post_encoder_forward(x_bf16, prepared_bf16))
    assert out_bf16.shape == (B, OUT_DIM), out_bf16.shape
    assert jnp.allclose(out_bf16, ref, atol=3e-2, rtol=3e-2), "bf16 mismatch vs reference"

    print("KERNEL_OK")
</pallas_src>

<mosaic_0001>
module attributes {stable_mosaic.version = 11 : i64} {
  func.func @post_encoder_kernel(%arg0: i32, %arg1: memref<8x128xf32, #tpu.memory_space<vmem>>, %arg2: memref<128x128xf32, #tpu.memory_space<vmem>>, %arg3: memref<1x128xf32, #tpu.memory_space<vmem>>, %arg4: memref<128x128xf32, #tpu.memory_space<vmem>>, %arg5: memref<1x128xf32, #tpu.memory_space<vmem>>, %arg6: memref<128x20xf32, #tpu.memory_space<vmem>>, %arg7: memref<1x20xf32, #tpu.memory_space<vmem>>, %arg8: memref<8x20xf32, #tpu.memory_space<vmem>>) attributes {dimension_semantics = [#tpu.dimension_semantics<parallel>], iteration_bounds = array<i64: 1>, scalar_prefetch = 0 : i64, scratch_operands = 0 : i64, tpu.core_type = #tpu.core_type<tc>, window_params = [{transform_indices = @transform_0, window_bounds = array<i64: 8, 128>}, {pipeline_mode = #tpu.pipeline_mode<synchronous>, transform_indices = @transform_1, window_bounds = array<i64: 128, 128>}, {pipeline_mode = #tpu.pipeline_mode<synchronous>, transform_indices = @transform_2, window_bounds = array<i64: 1, 128>}, {pipeline_mode = #tpu.pipeline_mode<synchronous>, transform_indices = @transform_3, window_bounds = array<i64: 128, 128>}, {pipeline_mode = #tpu.pipeline_mode<synchronous>, transform_indices = @transform_4, window_bounds = array<i64: 1, 128>}, {pipeline_mode = #tpu.pipeline_mode<synchronous>, transform_indices = @transform_5, window_bounds = array<i64: 128, 20>}, {pipeline_mode = #tpu.pipeline_mode<synchronous>, transform_indices = @transform_6, window_bounds = array<i64: 1, 20>}, {transform_indices = @transform_7, window_bounds = array<i64: 8, 20>}]} {
    %c0 = arith.constant 0 : index
    %c0_0 = arith.constant 0 : index
    %0 = vector.load %arg1[%c0, %c0_0] : memref<8x128xf32, #tpu.memory_space<vmem>>, vector<8x128xf32>
    %c0_1 = arith.constant 0 : index
    %c0_2 = arith.constant 0 : index
    %1 = vector.load %arg2[%c0_1, %c0_2] : memref<128x128xf32, #tpu.memory_space<vmem>>, vector<128x128xf32>
    %cst = arith.constant dense<0.000000e+00> : vector<8x128xf32>
    %2 = tpu.matmul %0, %1, %cst {dimension_numbers = #tpu.dot_dimension_numbers<[1], [0], [0], [1], [0, 0, 1, 1], [], []>} : vector<8x128xf32>, vector<128x128xf32>, vector<8x128xf32> -> vector<8x128xf32>
    %c0_3 = arith.constant 0 : index
    %c0_4 = arith.constant 0 : index
    %3 = vector.load %arg3[%c0_3, %c0_4] : memref<1x128xf32, #tpu.memory_space<vmem>>, vector<1x128xf32>
    %4 = vector.broadcast %3 : vector<1x128xf32> to vector<8x128xf32>
    %5 = arith.addf %2, %4 : vector<8x128xf32>
    %cst_5 = arith.constant 0.000000e+00 : f32
    %6 = vector.broadcast %cst_5 : f32 to vector<8x128xf32>
    %7 = arith.cmpf ogt, %5, %6 : vector<8x128xf32>
    %cst_6 = arith.constant 0.00999999977 : f32
    %8 = vector.broadcast %cst_6 : f32 to vector<8x128xf32>
    %9 = arith.mulf %8, %5 : vector<8x128xf32>
    %10 = arith.select %7, %5, %9 : vector<8x128xi1>, vector<8x128xf32>
    %c0_7 = arith.constant 0 : index
    %c0_8 = arith.constant 0 : index
    %11 = vector.load %arg4[%c0_7, %c0_8] : memref<128x128xf32, #tpu.memory_space<vmem>>, vector<128x128xf32>
    %cst_9 = arith.constant dense<0.000000e+00> : vector<8x128xf32>
    %12 = tpu.matmul %10, %11, %cst_9 {dimension_numbers = #tpu.dot_dimension_numbers<[1], [0], [0], [1], [0, 0, 1, 1], [], []>} : vector<8x128xf32>, vector<128x128xf32>, vector<8x128xf32> -> vector<8x128xf32>
    %c0_10 = arith.constant 0 : index
    %c0_11 = arith.constant 0 : index
    %13 = vector.load %arg5[%c0_10, %c0_11] : memref<1x128xf32, #tpu.memory_space<vmem>>, vector<1x128xf32>
    %14 = vector.broadcast %13 : vector<1x128xf32> to vector<8x128xf32>
    %15 = arith.addf %12, %14 : vector<8x128xf32>
    %cst_12 = arith.constant 0.000000e+00 : f32
    %16 = vector.broadcast %cst_12 : f32 to vector<8x128xf32>
    %17 = arith.cmpf ogt, %15, %16 : vector<8x128xf32>
    %cst_13 = arith.constant 0.00999999977 : f32
    %18 = vector.broadcast %cst_13 : f32 to vector<8x128xf32>
    %19 = arith.mulf %18, %15 : vector<8x128xf32>
    %20 = arith.select %17, %15, %19 : vector<8x128xi1>, vector<8x128xf32>
    %c0_14 = arith.constant 0 : index
    %c0_15 = arith.constant 0 : index
    %21 = vector.load %arg6[%c0_14, %c0_15] : memref<128x20xf32, #tpu.memory_space<vmem>>, vector<128x20xf32>
    %cst_16 = arith.constant dense<0.000000e+00> : vector<8x20xf32>
    %22 = tpu.matmul %20, %21, %cst_16 {dimension_numbers = #tpu.dot_dimension_numbers<[1], [0], [0], [1], [0, 0, 1, 1], [], []>} : vector<8x128xf32>, vector<128x20xf32>, vector<8x20xf32> -> vector<8x20xf32>
    %c0_17 = arith.constant 0 : index
    %c0_18 = arith.constant 0 : index
    %23 = vector.load %arg7[%c0_17, %c0_18] : memref<1x20xf32, #tpu.memory_space<vmem>>, vector<1x20xf32>
    %24 = vector.broadcast %23 : vector<1x20xf32> to vector<8x20xf32>
    %25 = arith.addf %22, %24 : vector<8x20xf32>
    %cst_19 = arith.constant 0.000000e+00 : f32
    %26 = vector.broadcast %cst_19 : f32 to vector<8x20xf32>
    %27 = arith.cmpf ogt, %25, %26 : vector<8x20xf32>
    %cst_20 = arith.constant 0.00999999977 : f32
    %28 = vector.broadcast %cst_20 : f32 to vector<8x20xf32>
    %29 = arith.mulf %28, %25 : vector<8x20xf32>
    %30 = arith.select %27, %25, %29 : vector<8x20xi1>, vector<8x20xf32>
    %c0_21 = arith.constant 0 : index
    %c0_22 = arith.constant 0 : index
    %31 = vector.load %arg8[%c0_21, %c0_22] : memref<8x20xf32, #tpu.memory_space<vmem>>, vector<8x20xf32>
    tpu.vector_store %arg8[%c0_21, %c0_22], %30 {strides = array<i32>} : memref<8x20xf32, #tpu.memory_space<vmem>>, vector<8x20xf32>,
    return
  }
  func.func @transform_0(%arg0: i32) -> (i32, i32) {
    %c0_i32 = arith.constant 0 : i32
    %c0_i32_0 = arith.constant 0 : i32
    return %arg0, %c0_i32 : i32, i32
  }
  func.func @transform_1(%arg0: i32) -> (i32, i32) {
    %c0_i32 = arith.constant 0 : i32
    %c0_i32_0 = arith.constant 0 : i32
    %c0_i32_1 = arith.constant 0 : i32
    return %c0_i32, %c0_i32_0 : i32, i32
  }
  func.func @transform_2(%arg0: i32) -> (i32, i32) {
    %c0_i32 = arith.constant 0 : i32
    %c0_i32_0 = arith.constant 0 : i32
    %c0_i32_1 = arith.constant 0 : i32
    return %c0_i32, %c0_i32_0 : i32, i32
  }
  func.func @transform_3(%arg0: i32) -> (i32, i32) {
    %c0_i32 = arith.constant 0 : i32
    %c0_i32_0 = arith.constant 0 : i32
    %c0_i32_1 = arith.constant 0 : i32
    return %c0_i32, %c0_i32_0 : i32, i32
  }
  func.func @transform_4(%arg0: i32) -> (i32, i32) {
    %c0_i32 = arith.constant 0 : i32
    %c0_i32_0 = arith.constant 0 : i32
    %c0_i32_1 = arith.constant 0 : i32
    return %c0_i32, %c0_i32_0 : i32, i32
  }
  func.func @transform_5(%arg0: i32) -> (i32, i32) {
    %c0_i32 = arith.constant 0 : i32
    %c0_i32_0 = arith.constant 0 : i32
    %c0_i32_1 = arith.constant 0 : i32
    return %c0_i32, %c0_i32_0 : i32, i32
  }
  func.func @transform_6(%arg0: i32) -> (i32, i32) {
    %c0_i32 = arith.constant 0 : i32
    %c0_i32_0 = arith.constant 0 : i32
    %c0_i32_1 = arith.constant 0 : i32
    return %c0_i32, %c0_i32_0 : i32, i32
  }
  func.func @transform_7(%arg0: i32) -> (i32, i32) {
    %c0_i32 = arith.constant 0 : i32
    %c0_i32_0 = arith.constant 0 : i32
    return %arg0, %c0_i32 : i32, i32
  }
}

</mosaic_0001>

<bundles_post_ra>
// kernel: tpu_custom_call.1
= control target key start
LH: loop header
LB: loop body
LE: loop exit
PB: predicated region body
PF: predicated region fallthrough
CT: control target
= control target key end

     0   :  { %12 = vsyncpa [#allocation3], 0  ;;  %s770_s0 = inlined_call_operand.vmem [shape: f32[8,128], index: 0, kind: input, shape index: {}]   ;;  %s771_s1 = inlined_call_operand.vmem [shape: f32[128,128], index: 1, kind: input, shape index: {}]   ;;  %s772_s2 = inlined_call_operand.vmem [shape: f32[1,128], index: 2, kind: input, shape index: {}]   ;;  %s773_s3 = inlined_call_operand.hbm [shape: f32[128,128], index: 3, kind: input, shape index: {}]   ;;  %s774_s4 = inlined_call_operand.vmem [shape: f32[1,128], index: 4, kind: input, shape index: {}]   ;;  %s775_s5 = inlined_call_operand.vmem [shape: f32[128,20], index: 5, kind: input, shape index: {}]   ;;  %s776_s6 = inlined_call_operand.vmem [shape: f32[1,20], index: 6, kind: input, shape index: {}]   ;;  %s777_s7 = inlined_call_operand.hbm [shape: f32[8,20], index: 7, kind: output, shape index: {}]  }
   0x1   :  { %13 = vsyncpa [#allocation4], 0  ;;  %s556_s24 = smov [#allocation2]  }
   0x2   :  { %s25_s25 = sshll.u32 %s556_s24, 4  ;;  %s26_s25 = int_to_ptr.vmem [resolvable:$true] %s25_s25 }
   0x3   :  { %s520_s26 = scalar_lea.vmem %s26_s25, 2048  ;;  %p525_p1 = scmp.lt.s32.totalorder %s26_s25, %s26_s25 }
   0x4   :  { %p521_p0 = scmp.ne.s32.totalorder %s26_s25, %s520_s26  ;;  %p526_p2 = scmp.lt.s32.totalorder %s520_s26, %s520_s26 }
   0x6   :  { %p527_p3 = por %p526_p2, %p525_p1 }
   0x8   :  { %p528_p4 = pnand %p527_p3, %p521_p0 }
   0xa   :  { %531 = shalt.err (!%p528_p4)
}
   0xb   :  { %s557_s27 = smov 128   ;;  %s558_s28 = smov 8  }
   0xc   :  { %31 = dma.hbm_to_vmem [thread:$0]  %s773_s3, 2048, %s26_s25, [#allocation3], %s557_s27, %s557_s27, %s558_s28  }
   0xd   :  { %552 = dma.done.wait [#allocation3], 2048  }
   0xe   :  { %553 = vsyncadd [#allocation3], 4294965248  ;;  %v559_v0 = vmov 0.0   ;;  %vm560_vm0 = vmmov 0   ;;  %v57_v1 = vld [vmem:[%s771_s1 + $0x78] sm:$0xff]  ;;  %v56_v2 = vld [vmem:[%s771_s1 + $0x70] sm:$0xff] }
   0xf   :  { %401 = vmatprep.subr.mxu0 %v559_v0  ;;  %433 = vmatprep.mubr.msk.f32.mxu0 %vm560_vm0, %v559_v0  ;;  %v55_v3 = vld [vmem:[%s771_s1 + $0x68] sm:$0xff]  ;;  %v54_v4 = vld [vmem:[%s771_s1 + $0x60] sm:$0xff]  ;;  %v153_v5 = vld [vmem:[#allocation2 + $0x78] sm:$0xff]  ;;  %vm330_vm4 = vcmask 162816  }
  0x10   :  { %436 = vmatprep.subr.mxu1 %v559_v0  ;;  %468 = vmatprep.mubr.msk.f32.mxu1 %vm560_vm0, %v559_v0  ;;  %v53_v6 = vld [vmem:[%s771_s1 + $0x58] sm:$0xff]  ;;  %v152_v7 = vld [vmem:[#allocation2 + $0x70] sm:$0xff]  ;;  %v151_v8 = vld [vmem:[#allocation2 + $0x68] sm:$0xff] }
  0x11   :  { %402 = vmatpush3.msra.mxu0 %v57_v1  ;;  %437 = vmatpush3.msra.mxu1 %v153_v5  ;;  %v52_v9 = vld [vmem:[%s771_s1 + $0x50] sm:$0xff]  ;;  %v150_v10 = vld [vmem:[#allocation2 + $0x60] sm:$0xff]  ;;  %v51_v11 = vld [vmem:[%s771_s1 + $0x48] sm:$0xff] }
  0x12   :  { %403 = vmatprep.subr.mxu0 %v559_v0  ;;  %438 = vmatprep.subr.mxu1 %v559_v0  ;;  %v149_v12 = vld [vmem:[#allocation2 + $0x58] sm:$0xff]  ;;  %v50_v13 = vld [vmem:[%s771_s1 + $0x40] sm:$0xff]  ;;  %v148_v14 = vld [vmem:[#allocation2 + $0x50] sm:$0xff] }
  0x13   :  { %404 = vmatpush3.msra.mxu0 %v56_v2  ;;  %439 = vmatpush3.msra.mxu1 %v152_v7  ;;  %v49_v15 = vld [vmem:[%s771_s1 + $0x38] sm:$0xff]  ;;  %v147_v16 = vld [vmem:[#allocation2 + $0x48] sm:$0xff]  ;;  %v48_v17 = vld [vmem:[%s771_s1 + $0x30] sm:$0xff] }
  0x14   :  { %405 = vmatprep.subr.mxu0 %v559_v0  ;;  %440 = vmatprep.subr.mxu1 %v559_v0  ;;  %v146_v18 = vld [vmem:[#allocation2 + $0x40] sm:$0xff]  ;;  %v47_v19 = vld [vmem:[%s771_s1 + $0x28] sm:$0xff]  ;;  %v145_v20 = vld [vmem:[#allocation2 + $0x38] sm:$0xff] }
  0x15   :  { %406 = vmatpush3.msra.mxu0 %v55_v3  ;;  %441 = vmatpush3.msra.mxu1 %v151_v8  ;;  %v46_v21 = vld [vmem:[%s771_s1 + $0x20] sm:$0xff]  ;;  %v144_v22 = vld [vmem:[#allocation2 + $0x30] sm:$0xff]  ;;  %v45_v23 = vld [vmem:[%s771_s1 + $0x18] sm:$0xff] }
  0x16   :  { %407 = vmatprep.subr.mxu0 %v559_v0  ;;  %442 = vmatprep.subr.mxu1 %v559_v0  ;;  %v143_v24 = vld [vmem:[#allocation2 + $0x28] sm:$0xff]  ;;  %v44_v25 = vld [vmem:[%s771_s1 + $0x10] sm:$0xff]  ;;  %v142_v26 = vld [vmem:[#allocation2 + $0x20] sm:$0xff] }
  0x17   :  { %408 = vmatpush3.msra.mxu0 %v54_v4  ;;  %443 = vmatpush3.msra.mxu1 %v150_v10  ;;  %v43_v27 = vld [vmem:[%s771_s1 + $0x8] sm:$0xff]  ;;  %v141_v28 = vld [vmem:[#allocation2 + $0x18] sm:$0xff]  ;;  %v42_v29 = vld [vmem:[%s771_s1] sm:$0xff] }
  0x18   :  { %409 = vmatprep.subr.mxu0 %v559_v0  ;;  %444 = vmatprep.subr.mxu1 %v559_v0  ;;  %v41_v30 = vld [vmem:[%s770_s0] sm:$0xff]  ;;  %v140_v31 = vld [vmem:[#allocation2 + $0x10] sm:$0xff]  ;;  %v139_v32 = vld [vmem:[#allocation2 + $0x8] sm:$0xff] }
  0x19   :  { %410 = vmatpush3.msra.mxu0 %v53_v6  ;;  %445 = vmatpush3.msra.mxu1 %v149_v12  ;;  %v138_v33 = vld [vmem:[#allocation2] sm:$0xff]  ;;  %v249_v34 = vld [vmem:[%s775_s5 + $0x78] sm:$0xff]  ;;  %v248_v35 = vld [vmem:[%s775_s5 + $0x70] sm:$0xff] }
  0x1a   :  { %411 = vmatprep.subr.mxu0 %v559_v0  ;;  %446 = vmatprep.subr.mxu1 %v559_v0  ;;  %v247_v36 = vld [vmem:[%s775_s5 + $0x68] sm:$0xff]  ;;  %v246_v37 = vld [vmem:[%s775_s5 + $0x60] sm:$0xff]  ;;  %v245_v38 = vld [vmem:[%s775_s5 + $0x58] sm:$0xff] }
  0x1b   :  { %412 = vmatpush3.msra.mxu0 %v52_v9  ;;  %447 = vmatpush3.msra.mxu1 %v148_v14  ;;  %v244_v39 = vld [vmem:[%s775_s5 + $0x50] sm:$0xff]  ;;  %v243_v40 = vld [vmem:[%s775_s5 + $0x48] sm:$0xff]  ;;  %v242_v41 = vld [vmem:[%s775_s5 + $0x40] sm:$0xff] }
  0x1c   :  { %413 = vmatprep.subr.mxu0 %v559_v0  ;;  %448 = vmatprep.subr.mxu1 %v559_v0  ;;  %v241_v42 = vld [vmem:[%s775_s5 + $0x38] sm:$0xff]  ;;  %v240_v43 = vld [vmem:[%s775_s5 + $0x30] sm:$0xff]  ;;  %v239_v44 = vld [vmem:[%s775_s5 + $0x28] sm:$0xff] }
  0x1d   :  { %414 = vmatpush3.msra.mxu0 %v51_v11  ;;  %449 = vmatpush3.msra.mxu1 %v147_v16  ;;  %v238_v45 = vld [vmem:[%s775_s5 + $0x20] sm:$0xff]  ;;  %v237_v46 = vld [vmem:[%s775_s5 + $0x18] sm:$0xff]  ;;  %v236_v53 = vld [vmem:[%s775_s5 + $0x10] sm:$0xff] }
  0x1e   :  { %415 = vmatprep.subr.mxu0 %v559_v0  ;;  %450 = vmatprep.subr.mxu1 %v559_v0  ;;  %v347_v47 = vld [vmem:[%s772_s2] ss:$0 sm:$0xff]  ;;  %v235_v54 = vld [vmem:[%s775_s5 + $0x8] sm:$0xff] }
  0x1f   :  { %416 = vmatpush3.msra.mxu0 %v50_v13  ;;  %451 = vmatpush3.msra.mxu1 %v146_v18  ;;  %v234_v55 = vld [vmem:[%s775_s5] sm:$0xff]  ;;  %s561_s5 = smov [#allocation5]  }
  0x20   :  { %417 = vmatprep.subr.mxu0 %v559_v0  ;;  %452 = vmatprep.subr.mxu1 %v559_v0  ;;  %v348_v56 = vld [vmem:[%s774_s4] ss:$0 sm:$0xff]  ;;  %s338_s26 = sshll.u32 %s561_s5, 4  ;;  %s339_s26 = int_to_ptr.vmem [resolvable:$true] %s338_s26 }
  0x21   :  { %418 = vmatpush3.msra.mxu0 %v49_v15  ;;  %453 = vmatpush3.msra.mxu1 %v145_v20  ;;  %v349_v62 = vld [vmem:[%s776_s6] ss:$0 sm:$0xff]  ;;  %s532_s4 = scalar_lea.vmem %s339_s26, 128  ;;  %p537_p6 = scmp.lt.s32.totalorder %s339_s26, %s339_s26 }
  0x22   :  { %419 = vmatprep.subr.mxu0 %v559_v0  ;;  %454 = vmatprep.subr.mxu1 %v559_v0  ;;  %p533_p5 = scmp.ne.s32.totalorder %s339_s26, %s532_s4  ;;  %p538_p7 = scmp.lt.s32.totalorder %s532_s4, %s532_s4 }
  0x23   :  { %420 = vmatpush3.msra.mxu0 %v48_v17  ;;  %455 = vmatpush3.msra.mxu1 %v144_v22 }
  0x24   :  { %421 = vmatprep.subr.mxu0 %v559_v0  ;;  %456 = vmatprep.subr.mxu1 %v559_v0  ;;  %p539_p8 = por %p538_p7, %p537_p6 }
  0x25   :  { %422 = vmatpush3.msra.mxu0 %v47_v19  ;;  %457 = vmatpush3.msra.mxu1 %v143_v24 }
  0x26   :  { %423 = vmatprep.subr.mxu0 %v559_v0  ;;  %458 = vmatprep.subr.mxu1 %v559_v0  ;;  %p540_p9 = pnand %p539_p8, %p533_p5 }
  0x27   :  { %424 = vmatpush3.msra.mxu0 %v46_v21  ;;  %459 = vmatpush3.msra.mxu1 %v142_v26 }
  0x28   :  { %425 = vmatprep.subr.mxu0 %v559_v0  ;;  %460 = vmatprep.subr.mxu1 %v559_v0 }
  0x29   :  { %426 = vmatpush3.msra.mxu0 %v45_v23  ;;  %461 = vmatpush3.msra.mxu1 %v141_v28 }
  0x2a   :  { %427 = vmatprep.subr.mxu0 %v559_v0  ;;  %462 = vmatprep.subr.mxu1 %v559_v0 }
  0x2b   :  { %428 = vmatpush3.msra.mxu0 %v44_v25  ;;  %463 = vmatpush3.msra.mxu1 %v140_v31 }
  0x2c   :  { %429 = vmatprep.subr.mxu0 %v559_v0  ;;  %464 = vmatprep.subr.mxu1 %v559_v0 }
  0x2d   :  { %430 = vmatpush3.msra.mxu0 %v43_v27  ;;  %465 = vmatpush3.msra.mxu1 %v139_v32 }
  0x2e   :  { %431 = vmatprep.subr.mxu0 %v559_v0  ;;  %466 = vmatprep.subr.mxu1 %v559_v0 }
  0x2f   :  { %432 = vmatpush3.msra.mxu0 %v42_v29  ;;  %467 = vmatpush3.msra.mxu1 %v138_v33 }
  0x30   :  { %434 = vmatmul.mubr.f32.vlgmr.msra.gmra.mxu0 %v41_v30  ;;  %471 = vmatprep.subr.mxu0 %v559_v0 }
  0x31   :  { %503 = vmatprep.mubr.msk.f32.mxu0 %vm560_vm0, %v559_v0  ;;  %472 = vmatpush3.msra.mxu0 %v249_v34 }
  0x32   :  { %473 = vmatprep.subr.mxu0 %v559_v0 }
  0x33   :  { %474 = vmatpush3.msra.mxu0 %v248_v35 }
  0x34   :  { %475 = vmatprep.subr.mxu0 %v559_v0 }
  0x35   :  { %476 = vmatpush3.msra.mxu0 %v247_v36 }
  0x36   :  { %477 = vmatprep.subr.mxu0 %v559_v0 }
  0x37   :  { %478 = vmatpush3.msra.mxu0 %v246_v37 }
  0x38   :  { %479 = vmatprep.subr.mxu0 %v559_v0 }
  0x39   :  { %480 = vmatpush3.msra.mxu0 %v245_v38 }
  0x3a   :  { %481 = vmatprep.subr.mxu0 %v559_v0 }
  0x3b   :  { %482 = vmatpush3.msra.mxu0 %v244_v39 }
  0x3c   :  { %483 = vmatprep.subr.mxu0 %v559_v0 }
  0x3d   :  { %484 = vmatpush3.msra.mxu0 %v243_v40 }
  0x3e   :  { %485 = vmatprep.subr.mxu0 %v559_v0 }
  0x3f   :  { %486 = vmatpush3.msra.mxu0 %v242_v41 }
  0x40   :  { %487 = vmatprep.subr.mxu0 %v559_v0 }
  0x41   :  { %488 = vmatpush3.msra.mxu0 %v241_v42 }
  0x42   :  { %489 = vmatprep.subr.mxu0 %v559_v0 }
  0x43   :  { %490 = vmatpush3.msra.mxu0 %v240_v43 }
  0x44   :  { %491 = vmatprep.subr.mxu0 %v559_v0 }
  0x45   :  { %492 = vmatpush3.msra.mxu0 %v239_v44 }
  0x46   :  { %493 = vmatprep.subr.mxu0 %v559_v0 }
  0x47   :  { %494 = vmatpush3.msra.mxu0 %v238_v45 }
  0x48   :  { %495 = vmatprep.subr.mxu0 %v559_v0 }
  0x49   :  { %496 = vmatpush3.msra.mxu0 %v237_v46 }
  0x4a   :  { %497 = vmatprep.subr.mxu0 %v559_v0 }
  0x4b   :  { %498 = vmatpush3.msra.mxu0 %v236_v53 }
  0x4c   :  { %499 = vmatprep.subr.mxu0 %v559_v0 }
  0x4d   :  { %500 = vmatpush3.msra.mxu0 %v235_v54 }
  0x4e   :  { %501 = vmatprep.subr.mxu0 %v559_v0 }
  0x4f   :  { %502 = vmatpush3.msra.mxu0 %v234_v55 }
  0xf0   :  { %v131_v48 = vpop.f32.mrf.mxu0 }
  0xf1   :  { %v132_v49 = vadd.f32 %v347_v47, %v131_v48 }
  0xf2   :  { %v435_v50 = vpop.f32.mrf.mxu0 }
  0xf3   :  { %v136_v51 = vmul.f32 0.01, %v132_v49  ;;  %vm135_vm1 = vcmp.gt.f32.partialorder %v132_v49, 0.0 }
  0xf5   :  { %v137_v52 = vsel %vm135_vm1, %v132_v49, %v136_v51 }
  0xf6   :  { %469 = vmatmul.mubr.f32.vlgmr.msra.gmra.mxu1 %v137_v52 }
 0x1b6   :  { %v227_v57 = vpop.f32.mrf.mxu1 }
 0x1b7   :  { %v228_v58 = vadd.f32 %v348_v56, %v227_v57 }
 0x1b8   :  { %v470_v59 = vpop.f32.mrf.mxu1 }
 0x1b9   :  { %vm231_vm2 = vcmp.gt.f32.partialorder %v228_v58, 0.0  ;;  %v232_v60 = vmul.f32 0.01, %v228_v58 }
 0x1bb   :  { %v233_v61 = vsel %vm231_vm2, %v228_v58, %v232_v60 }
 0x1bc   :  { %504 = vmatmul.mubr.f32.vlgmr.msra.gmra.mxu0 %v233_v61 }
 0x27c   :  { %v323_v63 = vpop.f32.mrf.mxu0 }
 0x27d   :  { %v324_v1 = vadd.f32 %v349_v62, %v323_v63 }
 0x27e   :  { %v505_v0 = vpop.f32.mrf.mxu0 }
 0x27f   :  { %vm327_vm3 = vcmp.gt.f32.partialorder %v324_v1, 0.0  ;;  %v328_v2 = vmul.f32 0.01, %v324_v1 }
 0x281   :  { %v329_v3 = vsel %vm327_vm3, %v324_v1, %v328_v2 }
 0x282   :  { %331 = vst.msk [vmem:[#allocation5] sm:$0xff] %vm330_vm4, %v329_v3 }
 0x283   :  { %543 = shalt.err (!%p540_p9)
}
 0x284   :  { %341 = dma.vmem_to_hbm [thread:$0]  %s339_s26, 128, %s777_s7, [#allocation4]  }
 0x285   :  { %554 = dma.done.wait [#allocation4], 128  }
 0x286   :  { %555 = vsyncadd [#allocation4], 4294967168 }
 0x287   :  { %345 = vsyncpa [#allocation3], 1 }
 0x288   :  { %346 = vsyncpa [#allocation4], 1 }

</bundles_post_ra>
